<compile_context>
chip_gen: v7x
topology: tpu7x:2x2x1
jax: 0.10.0
libtpu: 0.0.40
codegen_flags: <defaults>
</compile_context>

<pallas_src>
import math
from functools import partial

import jax
import jax.numpy as jnp
from jax import lax
from jax.experimental import pallas as pl
from jax.experimental.pallas import tpu as pltpu


def _partial_block_kernel(z_ref, w_ref, b_ref, out_ref, conf_ref,
                          *, slide_winsize, neg_slope):
    # z_ref:    (1, H+2, (W+2)*2*Cin)  padded [x*mask | mask], lane-dense rows
    # w_ref:    (3, (W+2)*2*Cin, 2*W*Cout)  banded weights (one slab per kh)
    # b_ref:    (1, W*Cout)            bias tiled per pixel
    # out_ref:  (1, H, W*Cout)         conv output, lane-dense
    # conf_ref: (1, H, W*Cout)         update mask replicated per channel
    H = out_ref.shape[1]
    WC = out_ref.shape[2]

    z = z_ref[0]                                   # (H+2, (W+2)*2*Cin)

    # Three MXU matmuls (one per vertical tap), accumulated in f32.
    res = None
    for kh in range(3):
        d = jnp.dot(z[kh:kh + H, :], w_ref[kh],
                    preferred_element_type=jnp.float32)
        res = d if res is None else res + d        # (H, 2*W*Cout)

    conv = res[:, :WC]                             # (H, W*Cout)  aligned slice
    msum = res[:, WC:]                             # (H, W*Cout)  per-ch replicated

    update_mask = jnp.clip(msum, 0.0, 1.0)
    mask_ratio = (slide_winsize / (msum + 1e-8)) * update_mask

    # PartialConv2d with bias: out = conv(x*m)*ratio + bias, then *update_mask
    out = (conv * mask_ratio + b_ref[...]) * update_mask
    # LeakyReLU (default negative_slope = 0.01)
    out = jnp.where(out > 0, out, neg_slope * out)

    out_ref[...] = out[None, :, :]
    # new_confidence = ReLU(update_mask); already in [0, 1]
    conf_ref[...] = update_mask[None, :, :]


def _build_banded_weight(weight, W):
    """weight: (Cout, Cin, 3, 3) OIHW.  Returns (3, (W+2)*2*Cin, 2*W*Cout):
    per-kh banded matrices mapping a padded lane-dense row (W+2)*[x*m | m]
    to [conv cols | mask-sum cols (replicated per channel)]."""
    Cout, Cin = weight.shape[0], weight.shape[1]
    Wp, Cin2, WC = W + 2, 2 * Cin, W * Cout
    Kdim = Wp * Cin2

    w_hwio = jnp.transpose(weight, (2, 3, 1, 0)).astype(jnp.float32)  # (3,3,Cin,Cout)

    w_in_idx = jnp.arange(Wp)[:, None]            # (Wp, 1)
    w_out_idx = jnp.arange(W)[None, :]            # (1, W)
    kw_rel = w_in_idx - w_out_idx                 # (Wp, W)
    valid = (kw_rel >= 0) & (kw_rel <= 2)
    kw_clamped = jnp.clip(kw_rel, 0, 2)

    zeros_c = jnp.zeros((Wp, Cin, W, Cout), jnp.float32)
    mask_part = jnp.broadcast_to(
        valid[:, None, :, None].astype(jnp.float32), (Wp, Cin, W, Cout))
    mask_block = jnp.concatenate([zeros_c, mask_part], axis=1)       # (Wp,2Cin,W,Cout)
    mask_cols = mask_block.reshape(Kdim, WC)

    slabs = []
    for kh in range(3):
        w_kh = w_hwio[kh]                          # (3, Cin, Cout)
        gathered = w_kh[kw_clamped]                # (Wp, W, Cin, Cout)
        conv_part = jnp.where(valid[:, :, None, None], gathered, 0.0)
        conv_part = jnp.transpose(conv_part, (0, 2, 1, 3))           # (Wp,Cin,W,Cout)
        conv_block = jnp.concatenate([conv_part, zeros_c], axis=1)   # (Wp,2Cin,W,Cout)
        conv_cols = conv_block.reshape(Kdim, WC)
        slabs.append(jnp.concatenate([conv_cols, mask_cols], axis=1))  # (Kdim, 2*WC)
    return jnp.stack(slabs, axis=0)                # (3, Kdim, 2*WC)


def partial_block(x, mask, weight, bias):
    """x, mask: (N, Cin, H, W) float32 (NCHW).  weight: (Cout, Cin, 3, 3),
    bias: (Cout,).  Returns (out, new_confidence), both (N, Cout, H, W)."""
    N, Cin, H, W = x.shape
    Cout = weight.shape[0]
    Cin2 = 2 * Cin
    Kdim = (W + 2) * Cin2
    WC = W * Cout

    # NCHW -> NHWC, stack [x*mask | mask] along channels, pad 1-pixel halo,
    # flatten (W+2, 2*Cin) into one lane-dense axis.
    x_nhwc = jnp.transpose(x, (0, 2, 3, 1))
    m_nhwc = jnp.transpose(mask, (0, 2, 3, 1))
    z = jnp.concatenate([x_nhwc * m_nhwc, m_nhwc], axis=-1)     # (N, H, W, 2Cin)
    z_pad = jnp.pad(z, ((0, 0), (1, 1), (1, 1), (0, 0)))
    z_flat = z_pad.reshape(N, H + 2, Kdim).astype(jnp.float32)  # (N, H+2, Kdim)

    w_ext = _build_banded_weight(weight, W)                     # (3, Kdim, 2*WC)
    b_tiled = jnp.tile(bias.astype(jnp.float32), W).reshape(1, WC)

    kernel = partial(_partial_block_kernel,
                     slide_winsize=float(3 * 3 * Cin), neg_slope=0.01)

    out_k, conf_k = pl.pallas_call(
        kernel,
        out_shape=(
            jax.ShapeDtypeStruct((N, H, WC), jnp.float32),
            jax.ShapeDtypeStruct((N, H, WC), jnp.float32),
        ),
        grid=(N,),
        in_specs=[
            pl.BlockSpec((1, H + 2, Kdim), lambda n: (n, 0, 0)),
            pl.BlockSpec((3, Kdim, 2 * WC), lambda n: (0, 0, 0)),
            pl.BlockSpec((1, WC), lambda n: (0, 0)),
        ],
        out_specs=[
            pl.BlockSpec((1, H, WC), lambda n: (n, 0, 0)),
            pl.BlockSpec((1, H, WC), lambda n: (n, 0, 0)),
        ],
        compiler_params=pltpu.CompilerParams(
            dimension_semantics=("parallel",)),
    )(z_flat, w_ext, b_tiled)

    # Layout plumbing back to NCHW (lane = w*Cout + c).
    out = jnp.transpose(out_k.reshape(N, H, W, Cout), (0, 3, 1, 2))
    conf = jnp.transpose(conf_k.reshape(N, H, W, Cout), (0, 3, 1, 2))
    return out, conf


def _reference_partial_block(x, mask, weight, bias):
    """Pure-JAX reference of PartialConv2d + LeakyReLU / ReLU (NCHW)."""
    dn = ('NCHW', 'OIHW', 'NCHW')
    xm = x * mask
    raw = lax.conv_general_dilated(xm, weight, (1, 1), 'SAME',
                                   dimension_numbers=dn)
    raw = raw + bias.reshape(1, -1, 1, 1)
    ones_w = jnp.ones_like(weight)
    msum = lax.conv_general_dilated(mask, ones_w, (1, 1), 'SAME',
                                    dimension_numbers=dn)
    slide = float(weight.shape[1] * weight.shape[2] * weight.shape[3])
    um = jnp.clip(msum, 0.0, 1.0)
    ratio = (slide / (msum + 1e-8)) * um
    bview = bias.reshape(1, -1, 1, 1)
    out = (raw - bview) * ratio + bview
    out = out * um
    out = jnp.where(out > 0, out, 0.01 * out)   # LeakyReLU
    conf = jnp.maximum(um, 0.0)                 # ReLU
    return out, conf


if __name__ == "__main__":
    N, Cin, Cout, H, W = 2, 4, 8, 16, 16
    key = jax.random.PRNGKey(0)
    kx, km, kw, kb = jax.random.split(key, 4)

    x = jax.random.normal(kx, (N, Cin, H, W), dtype=jnp.float32)
    # binary mask, same shape as input (multi_channel=True)
    mask = (jax.random.uniform(km, (N, Cin, H, W)) > 0.3).astype(jnp.float32)

    # xavier_uniform_ init for weight (Cout, Cin, 3, 3)
    fan_in = Cin * 3 * 3
    fan_out = Cout * 3 * 3
    xav_bound = math.sqrt(6.0 / (fan_in + fan_out))
    weight = jax.random.uniform(kw, (Cout, Cin, 3, 3), dtype=jnp.float32,
                                minval=-xav_bound, maxval=xav_bound)
    # default Conv2d bias init: U(-1/sqrt(fan_in), 1/sqrt(fan_in))
    b_bound = 1.0 / math.sqrt(fan_in)
    bias = jax.random.uniform(kb, (Cout,), dtype=jnp.float32,
                              minval=-b_bound, maxval=b_bound)

    out, conf = partial_block(x, mask, weight, bias)
    jax.block_until_ready((out, conf))

    out_ref, conf_ref = _reference_partial_block(x, mask, weight, bias)
    assert jnp.allclose(out, out_ref, rtol=1e-4, atol=1e-4), "output mismatch"
    assert jnp.allclose(conf, conf_ref, rtol=1e-4, atol=1e-4), "confidence mismatch"

    print("KERNEL_OK")
</pallas_src>

<mosaic_0001>
module attributes {stable_mosaic.version = 11 : i64} {
  func.func @_partial_block_kernel(%arg0: i32, %arg1: memref<1x18x144xf32, #tpu.memory_space<vmem>>, %arg2: memref<3x144x256xf32, #tpu.memory_space<vmem>>, %arg3: memref<1x128xf32, #tpu.memory_space<vmem>>, %arg4: memref<1x16x128xf32, #tpu.memory_space<vmem>>, %arg5: memref<1x16x128xf32, #tpu.memory_space<vmem>>) attributes {dimension_semantics = [#tpu.dimension_semantics<parallel>], iteration_bounds = array<i64: 2>, scalar_prefetch = 0 : i64, scratch_operands = 0 : i64, tpu.core_type = #tpu.core_type<tc>, window_params = [{transform_indices = @transform_0, window_bounds = array<i64: 1, 18, 144>}, {pipeline_mode = #tpu.pipeline_mode<synchronous>, transform_indices = @transform_1, window_bounds = array<i64: 3, 144, 256>}, {pipeline_mode = #tpu.pipeline_mode<synchronous>, transform_indices = @transform_2, window_bounds = array<i64: 1, 128>}, {transform_indices = @transform_3, window_bounds = array<i64: 1, 16, 128>}, {transform_indices = @transform_4, window_bounds = array<i64: 1, 16, 128>}]} {
    %c0 = arith.constant 0 : index
    %c0_0 = arith.constant 0 : index
    %c0_1 = arith.constant 0 : index
    %0 = vector.load %arg1[%c0, %c0_0, %c0_1] : memref<1x18x144xf32, #tpu.memory_space<vmem>>, vector<1x18x144xf32>
    %1 = vector.shape_cast %0 : vector<1x18x144xf32> to vector<18x144xf32>
    %2 = vector.extract_strided_slice %1 {offsets = [0, 0], sizes = [16, 144], strides = [1, 1]} : vector<18x144xf32> to vector<16x144xf32>
    %c0_2 = arith.constant 0 : index
    %c0_3 = arith.constant 0 : index
    %c0_4 = arith.constant 0 : index
    %3 = vector.load %arg2[%c0_2, %c0_3, %c0_4] : memref<3x144x256xf32, #tpu.memory_space<vmem>>, vector<1x144x256xf32>
    %4 = vector.shape_cast %3 : vector<1x144x256xf32> to vector<144x256xf32>
    %cst = arith.constant dense<0.000000e+00> : vector<16x256xf32>
    %5 = tpu.matmul %2, %4, %cst {dimension_numbers = #tpu.dot_dimension_numbers<[1], [0], [0], [1], [0, 0, 1, 1], [], []>} : vector<16x144xf32>, vector<144x256xf32>, vector<16x256xf32> -> vector<16x256xf32>
    %6 = vector.extract_strided_slice %1 {offsets = [1, 0], sizes = [16, 144], strides = [1, 1]} : vector<18x144xf32> to vector<16x144xf32>
    %c1 = arith.constant 1 : index
    %c0_5 = arith.constant 0 : index
    %c0_6 = arith.constant 0 : index
    %7 = vector.load %arg2[%c1, %c0_5, %c0_6] : memref<3x144x256xf32, #tpu.memory_space<vmem>>, vector<1x144x256xf32>
    %8 = vector.shape_cast %7 : vector<1x144x256xf32> to vector<144x256xf32>
    %cst_7 = arith.constant dense<0.000000e+00> : vector<16x256xf32>
    %9 = tpu.matmul %6, %8, %cst_7 {dimension_numbers = #tpu.dot_dimension_numbers<[1], [0], [0], [1], [0, 0, 1, 1], [], []>} : vector<16x144xf32>, vector<144x256xf32>, vector<16x256xf32> -> vector<16x256xf32>
    %10 = arith.addf %5, %9 : vector<16x256xf32>
    %11 = vector.extract_strided_slice %1 {offsets = [2, 0], sizes = [16, 144], strides = [1, 1]} : vector<18x144xf32> to vector<16x144xf32>
    %c2 = arith.constant 2 : index
    %c0_8 = arith.constant 0 : index
    %c0_9 = arith.constant 0 : index
    %12 = vector.load %arg2[%c2, %c0_8, %c0_9] : memref<3x144x256xf32, #tpu.memory_space<vmem>>, vector<1x144x256xf32>
    %13 = vector.shape_cast %12 : vector<1x144x256xf32> to vector<144x256xf32>
    %cst_10 = arith.constant dense<0.000000e+00> : vector<16x256xf32>
    %14 = tpu.matmul %11, %13, %cst_10 {dimension_numbers = #tpu.dot_dimension_numbers<[1], [0], [0], [1], [0, 0, 1, 1], [], []>} : vector<16x144xf32>, vector<144x256xf32>, vector<16x256xf32> -> vector<16x256xf32>
    %15 = arith.addf %10, %14 : vector<16x256xf32>
    %16 = vector.extract_strided_slice %15 {offsets = [0, 0], sizes = [16, 128], strides = [1, 1]} : vector<16x256xf32> to vector<16x128xf32>
    %17 = vector.extract_strided_slice %15 {offsets = [0, 128], sizes = [16, 128], strides = [1, 1]} : vector<16x256xf32> to vector<16x128xf32>
    %cst_11 = arith.constant 0.000000e+00 : f32
    %cst_12 = arith.constant 1.000000e+00 : f32
    %18 = vector.broadcast %cst_11 : f32 to vector<16x128xf32>
    %19 = arith.maximumf %18, %17 : vector<16x128xf32>
    %20 = vector.broadcast %cst_12 : f32 to vector<16x128xf32>
    %21 = arith.minimumf %20, %19 : vector<16x128xf32>
    %cst_13 = arith.constant 9.99999993E-9 : f32
    %22 = vector.broadcast %cst_13 : f32 to vector<16x128xf32>
    %23 = arith.addf %17, %22 : vector<16x128xf32>
    %cst_14 = arith.constant 3.600000e+01 : f32
    %24 = vector.broadcast %cst_14 : f32 to vector<16x128xf32>
    %25 = arith.divf %24, %23 : vector<16x128xf32>
    %26 = arith.mulf %25, %21 : vector<16x128xf32>
    %27 = arith.mulf %16, %26 : vector<16x128xf32>
    %c0_15 = arith.constant 0 : index
    %c0_16 = arith.constant 0 : index
    %28 = vector.load %arg3[%c0_15, %c0_16] : memref<1x128xf32, #tpu.memory_space<vmem>>, vector<1x128xf32>
    %29 = vector.broadcast %28 : vector<1x128xf32> to vector<16x128xf32>
    %30 = arith.addf %27, %29 : vector<16x128xf32>
    %31 = arith.mulf %30, %21 : vector<16x128xf32>
    %cst_17 = arith.constant 0.000000e+00 : f32
    %32 = vector.broadcast %cst_17 : f32 to vector<16x128xf32>
    %33 = arith.cmpf ogt, %31, %32 : vector<16x128xf32>
    %cst_18 = arith.constant 0.00999999977 : f32
    %34 = vector.broadcast %cst_18 : f32 to vector<16x128xf32>
    %35 = arith.mulf %34, %31 : vector<16x128xf32>
    %36 = arith.select %33, %31, %35 : vector<16x128xi1>, vector<16x128xf32>
    %37 = vector.shape_cast %36 : vector<16x128xf32> to vector<1x16x128xf32>
    %c0_19 = arith.constant 0 : index
    %c0_20 = arith.constant 0 : index
    %c0_21 = arith.constant 0 : index
    %38 = vector.load %arg4[%c0_19, %c0_20, %c0_21] : memref<1x16x128xf32, #tpu.memory_space<vmem>>, vector<1x16x128xf32>
    tpu.vector_store %arg4[%c0_19, %c0_20, %c0_21], %37 {strides = array<i32>} : memref<1x16x128xf32, #tpu.memory_space<vmem>>, vector<1x16x128xf32>,
    %39 = vector.shape_cast %21 : vector<16x128xf32> to vector<1x16x128xf32>
    %c0_22 = arith.constant 0 : index
    %c0_23 = arith.constant 0 : index
    %c0_24 = arith.constant 0 : index
    %40 = vector.load %arg5[%c0_22, %c0_23, %c0_24] : memref<1x16x128xf32, #tpu.memory_space<vmem>>, vector<1x16x128xf32>
    tpu.vector_store %arg5[%c0_22, %c0_23, %c0_24], %39 {strides = array<i32>} : memref<1x16x128xf32, #tpu.memory_space<vmem>>, vector<1x16x128xf32>,
    return
  }
  func.func @transform_0(%arg0: i32) -> (i32, i32, i32) {
    %c0_i32 = arith.constant 0 : i32
    %c0_i32_0 = arith.constant 0 : i32
    %c0_i32_1 = arith.constant 0 : i32
    return %arg0, %c0_i32, %c0_i32_0 : i32, i32, i32
  }
  func.func @transform_1(%arg0: i32) -> (i32, i32, i32) {
    %c0_i32 = arith.constant 0 : i32
    %c0_i32_0 = arith.constant 0 : i32
    %c0_i32_1 = arith.constant 0 : i32
    %c0_i32_2 = arith.constant 0 : i32
    return %c0_i32, %c0_i32_0, %c0_i32_1 : i32, i32, i32
  }
  func.func @transform_2(%arg0: i32) -> (i32, i32) {
    %c0_i32 = arith.constant 0 : i32
    %c0_i32_0 = arith.constant 0 : i32
    %c0_i32_1 = arith.constant 0 : i32
    return %c0_i32, %c0_i32_0 : i32, i32
  }
  func.func @transform_3(%arg0: i32) -> (i32, i32, i32) {
    %c0_i32 = arith.constant 0 : i32
    %c0_i32_0 = arith.constant 0 : i32
    %c0_i32_1 = arith.constant 0 : i32
    return %arg0, %c0_i32, %c0_i32_0 : i32, i32, i32
  }
  func.func @transform_4(%arg0: i32) -> (i32, i32, i32) {
    %c0_i32 = arith.constant 0 : i32
    %c0_i32_0 = arith.constant 0 : i32
    %c0_i32_1 = arith.constant 0 : i32
    return %arg0, %c0_i32, %c0_i32_0 : i32, i32, i32
  }
}

</mosaic_0001>

<bundles_post_ra>
// kernel: tpu_custom_call.1
= control target key start
LH: loop header
LB: loop body
LE: loop exit
PB: predicated region body
PF: predicated region fallthrough
CT: control target
= control target key end

     0   :  { %10 = vsyncpa [#allocation3], 0  ;;  %s1418_s0 = inlined_call_operand.vmem [shape: f32[2,18,144], index: 0, kind: input, shape index: {}]   ;;  %s1419_s1 = inlined_call_operand.hbm [shape: f32[3,144,256], index: 1, kind: input, shape index: {}]   ;;  %s1420_s2 = inlined_call_operand.vmem [shape: f32[1,128], index: 2, kind: input, shape index: {}]   ;;  %s1421_s3 = inlined_call_operand.hbm [shape: f32[2,16,128], index: 3, kind: output, shape index: {0}]   ;;  %s1422_s4 = inlined_call_operand.hbm [shape: f32[2,16,128], index: 4, kind: output, shape index: {1}]  }
   0x1   :  { %11 = vsyncpa [#allocation4], 0 }
   0x2   :  { %13 = vsyncpa [#allocation4 + $0x1], 0 }
   0x3   :  { %14 = vsyncpa [#allocation7], 0 }
   0x4   :  { %16 = vsyncpa [#allocation7 + $0x1], 0  ;;  %s1178_s15 = smov 0   ;;  %s1180_s16 = smov 0  }
   0x5   :  { %s1182_s17 = smov 0   ;;  %s1184_s18 = smov 0  }
   0x6 LB: > { %s1199_s19 = sadd.s32 4294967295, %s1144_s18   ;;  %s794_s20 = sadd.s32 4294967294, %s1144_s18   ;;  %s1144_s18 = sphi %s1184_s18, %s1438_s18   ;;  %s1140_s17 = sphi %s1182_s17, %s1437_s17   ;;  %s1136_s16 = sphi %s1180_s16, %s1436_s16   ;;  %s1132_s15 = sphi %s1178_s15, %s1435_s15  }
   0x7   : > { %s1203_s21 = sadd.s32 1, %s1144_s18   ;;  %s97_s22 = sadd.s32 1, %s1140_s17 }
   0x8   : > { %s94_s23 = ssub.s32 %s1144_s18, %s1203_s21  ;;  %p107_p0 = scmp.ne.s32.totalorder %s1140_s17, %s1136_s16 }
   0x9   : > { %p95_p1 = scmp.eq.s32.totalorder %s94_s23, 0  ;;  %p108_p2 = scmp.eq.s32.totalorder %s1199_s19, 1 }
   0xa   : > { %p113_p3 = scmp.ne.s32.totalorder %s1136_s16, %s1132_s15  ;;  %p114_p4 = scmp.eq.s32.totalorder %s794_s20, 1 }
   0xb   : > { %s1214_s24 = scalar_select %p95_p1, %s1140_s17, %s97_s22  }
   0xc   : > { %p1216_p5 = por %p108_p2, %p107_p0  ;;  %p1220_p6 = por %p114_p4, %p113_p3 }
   0xd   : > { %p795_p7 = scmp.ge.s32.totalorder %s1144_s18, 1  ;;  %p147_p8 = scmp.lt.s32.totalorder %s1144_s18, 3 }
   0xe   : > { %s1426_s25 = scalar_select %p1216_p5, 1, 0 }
   0xf   : > { %s1427_s26 = scalar_select %p1220_p6, 1, 0 }
  0x10   : > { %p1423_p9 = scmp.eq.s32.totalorder %s1199_s19, 0  ;;  %p1227_p10 = pnand %p795_p7, %p147_p8 }
  0x11   : > { %s1146_s28 = smov [#allocation2]   ;;  %s1018_s7 = scalar_lea.hbm %s1419_s1, 13824 }
  0x12   : > { %s1428_s27 = scalar_select %p1227_p10, 1, 0 }
  0x13   : > { %s159_s29 = sshll.u32 %s1146_s28, 4  ;;  %p963_p11 = pneg %p1227_p10  ;;  %s160_s29 = int_to_ptr.vmem [resolvable:$true] %s159_s29 }
  0x14   : > { %p1019_p13 = scmp.ne.s32.totalorder %s1419_s1, %s1018_s7  ;;  %p1025_p3 = scmp.lt.u32.totalorder %s1018_s7, %s1419_s1 }
  0x15   : > { %p1235_p12 = pnand %p1423_p9, %p963_p11 }
  0x17   : > { %p1020_p0 = pneg %p1235_p12 }
  0x19   : > { %p1021_p1 = pnand %p1020_p0, %p1019_p13 }
  0x1b   : > { %p1022_p2 = pneg %p1021_p1 }
  0x1d   : > { %p1027_p4 = pnand %p1025_p3, %p1022_p2 }
  0x1f   : > { %1030 = shalt.err (!%p1027_p4)
}
  0x20   : > { %s1031_s12 = scalar_lea.vmem %s160_s29, 13824  ;;  %p1039_p9 = scmp.lt.s32.totalorder %s160_s29, %s160_s29 }
  0x21   : > { %p1032_p7 = scmp.ne.s32.totalorder %s160_s29, %s1031_s12  ;;  %p1040_p6 = scmp.lt.s32.totalorder %s1031_s12, %s1031_s12 }
  0x23   : > { %p1034_p8 = pnand %p1032_p7, %p1020_p0  ;;  %p1041_p5 = por %p1040_p6, %p1039_p9 }
  0x25   : > { %p1035_p11 = pneg %p1034_p8 }
  0x27   : > { %p1042_p10 = pnand %p1041_p5, %p1035_p11 }
  0x29   : > { %1045 = shalt.err (!%p1042_p10)
}
  0x2a   : > { %s1147_s13 = smov 256   ;;  %s1148_s14 = smov 16  }
  0x2b   : > { %966 = dma.hbm_to_vmem [thread:$0]  (!%p1235_p12), %s1419_s1, 13824, %s160_s29, [#allocation3], %s1147_s13, %s1147_s13, %s1148_s14  }
  0x2c   : > { %p1430_p13 = scmp.ne.s32.totalorder %s1428_s27, 0 }
  0x2d   : > { %p1431_p1 = scmp.eq.s32.totalorder (!%p1430_p13), %s1199_s19, 0 }
  0x2e   : > { %186 = sbr.rel (%p1430_p13) target bundleno = 392 (0x188), region = 32 }
  0x35   : > { %1119 = dma.done.wait (%p1431_p1), [#allocation3], 13824   ;;  %p1432_p0 = pmov %p1431_p1 }
  0x36   : > { %v266_v0 = vld [vmem:[#allocation2 + $0x128] sm:$0xff]  ;;  %v268_v1 = vld [vmem:[#allocation2 + $0x138] sm:$0xff]  ;;  %v265_v5 = vld [vmem:[#allocation2 + $0x120] sm:$0xff]  ;;  %p217_p5 = scmp.lt.s32.totalorder %s1199_s19, 1  ;;  %vm320_vm0 = vcmask 130048   ;;  %vm307_vm1 = vcmask 1046528  }
  0x37   : > { %1121 = vsyncadd (%p1432_p0), [#allocation3], 4294953472  ;;  %v229_v2 = vld [vmem:[#allocation2 + $0x8] sm:$0xff]  ;;  %v820_v3 = vpack.c.bf16 %v268_v1, %v266_v0  ;;  %v231_v4 = vld [vmem:[#allocation2 + $0x18] sm:$0xff]  ;;  %vm520_vm2 = vcmask 1045504   ;;  %s1318_s5 = sand.u32 1, %s1136_s16  }
  0x38   : > { %v267_v6 = vld [vmem:[#allocation2 + $0x130] sm:$0xff]  ;;  %v856_v7 = vpack.c.bf16 %v231_v4, %v229_v2  ;;  %v228_v9 = vld [vmem:[#allocation2] sm:$0xff]  ;;  %v270_v11 = vld [vmem:[#allocation2 + $0x148] sm:$0xff]  ;;  %s1265_s23 = scalar_select %p217_p5, %s1199_s19, 1 }
  0x39   : > { %v822_v8 = vpack.c.bf16 %v267_v6, %v265_v5  ;;  %v230_v10 = vld [vmem:[#allocation2 + $0x10] sm:$0xff]  ;;  %821 = vmatprep.subr.bf16.mxu1 %v820_v3  ;;  %v272_v13 = vld [vmem:[#allocation2 + $0x158] sm:$0xff]  ;;  %v233_v14 = vld [vmem:[#allocation2 + $0x28] sm:$0xff]  ;;  %s800_s6 = sshll.u32 %s1318_s5, 4  ;;  %s818_s9 = sshll.u32 %s1199_s19, 8 }
  0x3a   : > { %v858_v12 = vpack.c.bf16 %v230_v10, %v228_v9  ;;  %v235_v15 = vld [vmem:[#allocation2 + $0x38] sm:$0xff]  ;;  %857 = vmatprep.subr.bf16.mxu0 %v856_v7  ;;  %v824_v16 = vpack.c.bf16 %v272_v13, %v270_v11  ;;  %v269_v18 = vld [vmem:[#allocation2 + $0x140] sm:$0xff]  ;;  %v271_v19 = vld [vmem:[#allocation2 + $0x150] sm:$0xff]  ;;  %s954_s27 = smul.u32 48, %s1265_s23  ;;  %s216_s7 = scalar_lea.vmem [#allocation6], %s800_s6 }
  0x3b   : > { %823 = vmatpush1.bf16.msra.mxu1 %v822_v8  ;;  %v860_v17 = vpack.c.bf16 %v235_v15, %v233_v14  ;;  %v232_v20 = vld [vmem:[#allocation2 + $0x20] sm:$0xff]  ;;  %v826_v21 = vpack.c.bf16 %v271_v19, %v269_v18  ;;  %v234_v22 = vld [vmem:[#allocation2 + $0x30] sm:$0xff]  ;;  %v274_v23 = vld [vmem:[#allocation2 + $0x168] sm:$0xff]  ;;  %s688_s8 = sshll.u32 %s216_s7, 4  ;;  %s1331_s12 = scalar_lea.hbm %s1422_s4, %s818_s9  ;;  %s1324_s8 = int_to_ptr.vmem [resolvable:$true] %s688_s8 }
  0x3c   : > { %859 = vmatpush1.bf16.msra.mxu0 %v858_v12  ;;  %v276_v24 = vld [vmem:[#allocation2 + $0x178] sm:$0xff]  ;;  %825 = vmatprep.subr.bf16.mxu1 %v824_v16  ;;  %v862_v25 = vpack.c.bf16 %v234_v22, %v232_v20  ;;  %v237_v27 = vld [vmem:[#allocation2 + $0x48] sm:$0xff]  ;;  %v273_v29 = vld [vmem:[#allocation2 + $0x160] sm:$0xff]  ;;  %s1271_s30 = scalar_lea.vmem %s1418_s0, %s954_s27  ;;  %s659_s13 = scalar_lea.sflag [#allocation7], %s1318_s5 }
  0x3d   : > { %861 = vmatprep.subr.bf16.mxu0 %v860_v17  ;;  %v828_v26 = vpack.c.bf16 %v276_v24, %v274_v23  ;;  %v239_v28 = vld [vmem:[#allocation2 + $0x58] sm:$0xff]  ;;  %v275_v31 = vld [vmem:[#allocation2 + $0x170] sm:$0xff]  ;;  %v236_v32 = vld [vmem:[#allocation2 + $0x40] sm:$0xff]  ;;  %s1046_s14 = scalar_lea.vmem %s1324_s8, 256  ;;  %p1433_p9 = scmp.ne.s32.totalorder %s1426_s25, 0 }
  0x3e   : > { %v864_v30 = vpack.c.bf16 %v239_v28, %v237_v27  ;;  %v238_v33 = vld [vmem:[#allocation2 + $0x50] sm:$0xff]  ;;  %v830_v34 = vpack.c.bf16 %v275_v31, %v273_v29  ;;  %v278_v35 = vld [vmem:[#allocation2 + $0x188] sm:$0xff]  ;;  %v280_v36 = vld [vmem:[#allocation2 + $0x198] sm:$0xff]  ;;  %p1047_p6 = scmp.ne.s32.totalorder %s1324_s8, %s1046_s14  ;;  %s1149_s20 = smov [#allocation6]  }
  0x3f   : > { %827 = vmatpush1.bf16.msra.mxu1 %v826_v21  ;;  %v241_v37 = vld [vmem:[#allocation2 + $0x68] sm:$0xff]  ;;  %v866_v38 = vpack.c.bf16 %v238_v33, %v236_v32  ;;  %v832_v39 = vpack.c.bf16 %v280_v36, %v278_v35  ;;  %v243_v40 = vld [vmem:[#allocation2 + $0x78] sm:$0xff]  ;;  %v277_v41 = vld [vmem:[#allocation2 + $0x180] sm:$0xff]  ;;  %s1050_s22 = sshll.u32 %s1149_s20, 4  ;;  %s1051_s22 = int_to_ptr.vmem [resolvable:$false] %s1050_s22 }
  0x40   : > { %863 = vmatpush1.bf16.msra.mxu0 %v862_v25  ;;  %829 = vmatprep.subr.bf16.mxu1 %v828_v26  ;;  %v279_v42 = vld [vmem:[#allocation2 + $0x190] sm:$0xff]  ;;  %v868_v43 = vpack.c.bf16 %v243_v40, %v241_v37  ;;  %v240_v44 = vld [vmem:[#allocation2 + $0x60] sm:$0xff]  ;;  %v282_v46 = vld [vmem:[#allocation2 + $0x1a8] sm:$0xff]  ;;  %p1048_p10 = pnand %p1047_p6, %p1433_p9  ;;  %s1052_s23 = scalar_lea.vmem %s1051_s22, 512 }
  0x41   : > { %865 = vmatprep.subr.bf16.mxu0 %v864_v30  ;;  %v242_v45 = vld [vmem:[#allocation2 + $0x70] sm:$0xff]  ;;  %v284_v47 = vld [vmem:[#allocation2 + $0x1b8] sm:$0xff]  ;;  %v245_v48 = vld [vmem:[#allocation2 + $0x88] sm:$0xff]  ;;  %v834_v50 = vpack.c.bf16 %v279_v42, %v277_v41  ;;  %p1053_p2 = scmp.lt.s32.totalorder %s1324_s8, %s1051_s22  ;;  %p1054_p3 = scmp.lt.s32.totalorder %s1052_s23, %s1046_s14 }
  0x42   : > { %v247_v49 = vld [vmem:[#allocation2 + $0x98] sm:$0xff]  ;;  %v870_v51 = vpack.c.bf16 %v242_v45, %v240_v44  ;;  %v836_v52 = vpack.c.bf16 %v284_v47, %v282_v46  ;;  %v281_v53 = vld [vmem:[#allocation2 + $0x1a0] sm:$0xff]  ;;  %v283_v54 = vld [vmem:[#allocation2 + $0x1b0] sm:$0xff]  ;;  %p1049_p12 = pneg %p1048_p10 }
  0x43   : > { %831 = vmatpush1.bf16.msra.mxu1 %v830_v34  ;;  %v244_v55 = vld [vmem:[#allocation2 + $0x80] sm:$0xff]  ;;  %v872_v56 = vpack.c.bf16 %v247_v49, %v245_v48  ;;  %v246_v57 = vld [vmem:[#allocation2 + $0x90] sm:$0xff]  ;;  %v286_v58 = vld [vmem:[#allocation2 + $0x1c8] sm:$0xff]  ;;  %v838_v62 = vpack.c.bf16 %v283_v54, %v281_v53  ;;  %p1055_p4 = por %p1054_p3, %p1053_p2 }
  0x44   : > { %867 = vmatpush1.bf16.msra.mxu0 %v866_v38  ;;  %833 = vmatprep.subr.bf16.mxu1 %v832_v39  ;;  %v288_v59 = vld [vmem:[#allocation2 + $0x1d8] sm:$0xff]  ;;  %v249_v60 = vld [vmem:[#allocation2 + $0xa8] sm:$0xff]  ;;  %v874_v63 = vpack.c.bf16 %v246_v57, %v244_v55  ;;  %v285_v1 = vld [vmem:[#allocation2 + $0x1c0] sm:$0xff] }
  0x45   : > { %869 = vmatprep.subr.bf16.mxu0 %v868_v43  ;;  %v251_v61 = vld [vmem:[#allocation2 + $0xb8] sm:$0xff]  ;;  %v840_v0 = vpack.c.bf16 %v288_v59, %v286_v58  ;;  %v287_v2 = vld [vmem:[#allocation2 + $0x1d0] sm:$0xff]  ;;  %v248_v3 = vld [vmem:[#allocation2 + $0xa0] sm:$0xff]  ;;  %p1056_p7 = pnand %p1055_p4, %p1049_p12 }
  0x46   : > { %v876_v4 = vpack.c.bf16 %v251_v61, %v249_v60  ;;  %v250_v5 = vld [vmem:[#allocation2 + $0xb0] sm:$0xff]  ;;  %v290_v6 = vld [vmem:[#allocation2 + $0x1e8] sm:$0xff]  ;;  %v292_v7 = vld [vmem:[#allocation2 + $0x1f8] sm:$0xff]  ;;  %v842_v10 = vpack.c.bf16 %v287_v2, %v285_v1 }
  0x47   : > { %835 = vmatpush1.bf16.msra.mxu1 %v834_v50  ;;  %v253_v8 = vld [vmem:[#allocation2 + $0xc8] sm:$0xff]  ;;  %v255_v9 = vld [vmem:[#allocation2 + $0xd8] sm:$0xff]  ;;  %v878_v11 = vpack.c.bf16 %v250_v5, %v248_v3  ;;  %v844_v12 = vpack.c.bf16 %v292_v7, %v290_v6  ;;  %v289_v13 = vld [vmem:[#allocation2 + $0x1e0] sm:$0xff] }
  0x48   : > { %871 = vmatpush1.bf16.msra.mxu0 %v870_v51  ;;  %837 = vmatprep.subr.bf16.mxu1 %v836_v52  ;;  %v291_v14 = vld [vmem:[#allocation2 + $0x1f0] sm:$0xff]  ;;  %v252_v15 = vld [vmem:[#allocation2 + $0xc0] sm:$0xff]  ;;  %v880_v16 = vpack.c.bf16 %v255_v9, %v253_v8  ;;  %v294_v18 = vld [vmem:[#allocation2 + $0x208] sm:$0xff] }
  0x49   : > { %873 = vmatprep.subr.bf16.mxu0 %v872_v56  ;;  %v254_v17 = vld [vmem:[#allocation2 + $0xd0] sm:$0xff]  ;;  %v296_v19 = vld [vmem:[#allocation2 + $0x218] sm:$0xff]  ;;  %v257_v20 = vld [vmem:[#allocation2 + $0xe8] sm:$0xff]  ;;  %v846_v22 = vpack.c.bf16 %v291_v14, %v289_v13 }
  0x4a   : > { %v259_v21 = vld [vmem:[#allocation2 + $0xf8] sm:$0xff]  ;;  %v1274_v23 = vld [vmem:[%s1271_s30 + $0x8] sm:$0xff]  ;;  %v882_v25 = vpack.c.bf16 %v254_v17, %v252_v15  ;;  %v848_v26 = vpack.c.bf16 %v296_v19, %v294_v18  ;;  %v293_v27 = vld [vmem:[#allocation2 + $0x200] sm:$0xff] }
  0x4b   : > { %839 = vmatpush1.bf16.msra.mxu1 %v838_v62  ;;  %v1277_v24 = vld [vmem:[%s1271_s30 + $0x18] sm:$0xff]  ;;  %v295_v28 = vld [vmem:[#allocation2 + $0x210] sm:$0xff]  ;;  %v256_v29 = vld [vmem:[#allocation2 + $0xe0] sm:$0xff]  ;;  %v311_v30 = vrot.slane %v1274_v23, 1  ;;  %v884_v32 = vpack.c.bf16 %v259_v21, %v257_v20  ;;  %805 = vmatprep.mubr.msk.f32.mxu0 %vm320_vm0, %v1274_v23  ;;  %v524_v8 = vrot.slane %v1274_v23, 2 }
  0x4c   : > { %875 = vmatpush1.bf16.msra.mxu0 %v874_v63  ;;  %841 = vmatprep.subr.bf16.mxu1 %v840_v0  ;;  %v312_v31 = vrot.slane %v1277_v24, 1  ;;  %v258_v33 = vld [vmem:[#allocation2 + $0xf0] sm:$0xff]  ;;  %v298_v34 = vld [vmem:[#allocation2 + $0x228] sm:$0xff]  ;;  %v300_v35 = vld [vmem:[#allocation2 + $0x238] sm:$0xff]  ;;  %v850_v39 = vpack.c.bf16 %v295_v28, %v293_v27  ;;  %v525_v9 = vrot.slane %v1277_v24, 2 }
  0x4d   : > { %877 = vmatprep.subr.bf16.mxu0 %v876_v4  ;;  %v261_v36 = vld [vmem:[#allocation2 + $0x108] sm:$0xff]  ;;  %v263_v37 = vld [vmem:[#allocation2 + $0x118] sm:$0xff]  ;;  %v297_v40 = vld [vmem:[#allocation2 + $0x220] sm:$0xff]  ;;  %v886_v42 = vpack.c.bf16 %v258_v33, %v256_v29  ;;  %v852_v43 = vpack.c.bf16 %v300_v35, %v298_v34 }
  0x4e   : > { %v313_v38 = vsel %vm307_vm1, %v311_v30, %v312_v31  ;;  %v299_v41 = vld [vmem:[#allocation2 + $0x230] sm:$0xff]  ;;  %v260_v44 = vld [vmem:[#allocation2 + $0x100] sm:$0xff]  ;;  %v888_v47 = vpack.c.bf16 %v263_v37, %v261_v36  ;;  %v485_v49 = vld [vmem:[#allocation2 + $0x248] sm:$0xff]  ;;  %v526_v18 = vsel %vm520_vm2, %v524_v8, %v525_v9 }
  0x4f   : > { %843 = vmatpush1.bf16.msra.mxu1 %v842_v10  ;;  %803 = vmatprep.mubr.msk.f32.mxu1 %vm320_vm0, %v313_v38  ;;  %v1286_v45 = vld [vmem:[%s1271_s30] sm:$0xff]  ;;  %v1289_v46 = vld [vmem:[%s1271_s30 + $0x10] sm:$0xff]  ;;  %v487_v50 = vld [vmem:[#allocation2 + $0x258] sm:$0xff]  ;;  %v854_v51 = vpack.c.bf16 %v299_v41, %v297_v40 }
  0x50   : > { %879 = vmatpush1.bf16.msra.mxu0 %v878_v11  ;;  %845 = vmatprep.subr.bf16.mxu1 %v844_v12  ;;  %v262_v48 = vld [vmem:[#allocation2 + $0x110] sm:$0xff]  ;;  %v308_v52 = vrot.slane %v1286_v45, 1  ;;  %v309_v53 = vrot.slane %v1289_v46, 1  ;;  %v892_v55 = vpack.c.bf16 %v487_v50, %v485_v49  ;;  %v484_v56 = vld [vmem:[#allocation2 + $0x240] sm:$0xff]  ;;  %v489_v58 = vld [vmem:[#allocation2 + $0x268] sm:$0xff] }
  0x51   : > { %881 = vmatprep.subr.bf16.mxu0 %v880_v16  ;;  %v890_v54 = vpack.c.bf16 %v262_v48, %v260_v44  ;;  %v486_v57 = vld [vmem:[#allocation2 + $0x250] sm:$0xff]  ;;  %v491_v59 = vld [vmem:[#allocation2 + $0x278] sm:$0xff]  ;;  %v227_v62 = vld [vmem:[%s1271_s30 + $0x28] sm:$0x3] }
  0x52   : > { %v310_v60 = vsel %vm307_vm1, %v308_v52, %v309_v53  ;;  %v894_v61 = vpack.c.bf16 %v486_v57, %v484_v56  ;;  %v1296_v63 = vld [vmem:[%s1271_s30 + $0x20] sm:$0x3]  ;;  %v896_v0 = vpack.c.bf16 %v491_v59, %v489_v58  ;;  %v490_v2 = vld [vmem:[#allocation2 + $0x270] sm:$0xff]  ;;  %v316_v3 = vrot.slane %v227_v62, 1  ;;  %v493_v5 = vld [vmem:[#allocation2 + $0x288] sm:$0xff] }
  0x53   : > { %847 = vmatpush1.bf16.msra.mxu1 %v846_v22  ;;  %v488_v1 = vld [vmem:[#allocation2 + $0x260] sm:$0xff]  ;;  %v314_v4 = vrot.slane %v1296_v63, 1  ;;  %v495_v6 = vld [vmem:[#allocation2 + $0x298] sm:$0xff]  ;;  %v529_v12 = vrot.slane %v227_v62, 2  ;;  %v494_v15 = vld [vmem:[#allocation2 + $0x290] sm:$0xff]  ;;  %v527_v56 = vrot.slane %v1296_v63, 2 }
  0x54   : > { %883 = vmatpush1.bf16.msra.mxu0 %v882_v25  ;;  %849 = vmatprep.subr.bf16.mxu1 %v848_v26  ;;  %v317_v7 = vsel %vm307_vm1, %v312_v31, %v316_v3  ;;  %v898_v10 = vpack.c.bf16 %v490_v2, %v488_v1  ;;  %v900_v13 = vpack.c.bf16 %v495_v6, %v493_v5  ;;  %v492_v14 = vld [vmem:[#allocation2 + $0x280] sm:$0xff]  ;;  %v497_v16 = vld [vmem:[#allocation2 + $0x2a8] sm:$0xff]  ;;  %v499_v17 = vld [vmem:[#allocation2 + $0x2b8] sm:$0xff]  ;;  %v522_v58 = vrot.slane %v1289_v46, 2 }
  0x55   : > { %885 = vmatprep.subr.bf16.mxu0 %v884_v32  ;;  %v315_v11 = vsel %vm307_vm1, %v309_v53, %v314_v4  ;;  %v902_v19 = vpack.c.bf16 %v494_v15, %v492_v14  ;;  %v530_v20 = vsel %vm520_vm2, %v525_v9, %v529_v12  ;;  %v904_v21 = vpack.c.bf16 %v499_v17, %v497_v16  ;;  %v496_v22 = vld [vmem:[#allocation2 + $0x2a0] sm:$0xff]  ;;  %v498_v23 = vld [vmem:[#allocation2 + $0x2b0] sm:$0xff]  ;;  %v501_v25 = vld [vmem:[#allocation2 + $0x2c8] sm:$0xff] }
  0x56   : > { %v503_v26 = vld [vmem:[#allocation2 + $0x2d8] sm:$0xff]  ;;  %v500_v28 = vld [vmem:[#allocation2 + $0x2c0] sm:$0xff]  ;;  %v502_v29 = vld [vmem:[#allocation2 + $0x2d0] sm:$0xff]  ;;  %v521_v59 = vrot.slane %v1286_v45, 2 }
  0x57   : > { %851 = vmatpush1.bf16.msra.mxu1 %v850_v39  ;;  %v908_v27 = vpack.c.bf16 %v503_v26, %v501_v25  ;;  %v505_v30 = vld [vmem:[#allocation2 + $0x2e8] sm:$0xff]  ;;  %v507_v31 = vld [vmem:[#allocation2 + $0x2f8] sm:$0xff]  ;;  %v910_v32 = vpack.c.bf16 %v502_v29, %v500_v28  ;;  %v504_v34 = vld [vmem:[#allocation2 + $0x2e0] sm:$0xff] }
  0x58   : > { %887 = vmatpush1.bf16.msra.mxu0 %v886_v42  ;;  %853 = vmatprep.subr.bf16.mxu1 %v852_v43  ;;  %v912_v33 = vpack.c.bf16 %v507_v31, %v505_v30  ;;  %v506_v35 = vld [vmem:[#allocation2 + $0x2f0] sm:$0xff]  ;;  %v509_v36 = vld [vmem:[#allocation2 + $0x308] sm:$0xff]  ;;  %v511_v37 = vld [vmem:[#allocation2 + $0x318] sm:$0xff] }
  0x59   : > { %889 = vmatprep.subr.bf16.mxu0 %v888_v47  ;;  %v914_v38 = vpack.c.bf16 %v506_v35, %v504_v34  ;;  %v916_v39 = vpack.c.bf16 %v511_v37, %v509_v36  ;;  %v508_v40 = vld [vmem:[#allocation2 + $0x300] sm:$0xff]  ;;  %v510_v41 = vld [vmem:[#allocation2 + $0x310] sm:$0xff]  ;;  %v513_v42 = vld [vmem:[#allocation2 + $0x328] sm:$0xff] }
  0x5a   : > { %v515_v43 = vld [vmem:[#allocation2 + $0x338] sm:$0xff]  ;;  %v918_v44 = vpack.c.bf16 %v510_v41, %v508_v40  ;;  %v512_v48 = vld [vmem:[#allocation2 + $0x320] sm:$0xff]  ;;  %v514_v49 = vld [vmem:[#allocation2 + $0x330] sm:$0xff] }
  0x5b   : > { %855 = vmatpush1.bf16.msra.mxu1 %v854_v51  ;;  %v920_v47 = vpack.c.bf16 %v515_v43, %v513_v42  ;;  %v517_v50 = vld [vmem:[#allocation2 + $0x348] sm:$0xff]  ;;  %v519_v51 = vld [vmem:[#allocation2 + $0x358] sm:$0xff]  ;;  %v922_v52 = vpack.c.bf16 %v514_v49, %v512_v48 }
  0x5c   : > { %891 = vmatpush1.bf16.msra.mxu0 %v890_v54  ;;  %928 = vmatprep.subr.bf16.mxu1 %v892_v55  ;;  %v924_v53 = vpack.c.bf16 %v519_v51, %v517_v50  ;;  %v516_v54 = vld [vmem:[#allocation2 + $0x340] sm:$0xff] }
  0x5d   : > { %893 = vmatprep.subr.bf16.mxu0 %v892_v55  ;;  %v518_v55 = vld [vmem:[#allocation2 + $0x350] sm:$0xff] }
  0x5e   : > { %390 = vmatmul.mubr.f32.vlgmr.msra.gmra.mrb[0].mxu1 %v310_v60  ;;  %v926_v57 = vpack.c.bf16 %v518_v55, %v516_v54  ;;  %v528_v60 = vsel %vm520_vm2, %v522_v58, %v527_v56 }
  0x5f   : > { %471 = vmatmul.mubr.f32.vlgmr.msra.gmra.mrb[0].mxu0 %v1286_v45  ;;  %937 = vmatpush1.bf16.msra.mxu1 %v894_v61 }
  0x60   : > { %895 = vmatpush1.bf16.msra.mxu0 %v894_v61  ;;  %929 = vmatprep.subr.bf16.mxu1 %v896_v0  ;;  %v523_v61 = vsel %vm520_vm2, %v521_v59, %v522_v58 }
  0x61   : > { %897 = vmatprep.subr.bf16.mxu0 %v896_v0  ;;  %804 = vmatprep.mubr.msk.f32.mxu1 %vm320_vm0, %v317_v7 }
  0x62   : > { %806 = vmatprep.mubr.msk.f32.mxu0 %vm320_vm0, %v1277_v24  ;;  %396 = vmatmul.mubr.f32.gmra.mrb[2].mxu1 %v315_v11  ;;  %v906_v24 = vpack.c.bf16 %v498_v23, %v496_v22 }
  0x63   : > { %938 = vmatpush1.bf16.msra.mxu1 %v898_v10  ;;  %477 = vmatmul.mubr.f32.gmra.mrb[2].mxu0 %v1289_v46 }
  0x64   : > { %899 = vmatpush1.bf16.msra.mxu0 %v898_v10  ;;  %930 = vmatprep.subr.bf16.mxu1 %v900_v13 }
  0x65   : > { %901 = vmatprep.subr.bf16.mxu0 %v900_v13  ;;  %807 = vmatprep.mubr.msk.f32.mxu0 %vm320_vm0, %v526_v18 }
  0x66   : > { %808 = vmatprep.mubr.msk.f32.mxu1 %vm320_vm0, %v530_v20 }
  0x67   : > { %939 = vmatpush1.bf16.msra.mxu1 %v902_v19 }
  0x68   : > { %903 = vmatpush1.bf16.msra.mxu0 %v902_v19  ;;  %931 = vmatprep.subr.bf16.mxu1 %v904_v21 }
  0x69   : > { %905 = vmatprep.subr.bf16.mxu0 %v904_v21 }
  0x6b   : > { %940 = vmatpush1.bf16.msra.mxu1 %v906_v24 }
  0x6c   : > { %907 = vmatpush1.bf16.msra.mxu0 %v906_v24  ;;  %932 = vmatprep.subr.bf16.mxu1 %v908_v27 }
  0x6d   : > { %909 = vmatprep.subr.bf16.mxu0 %v908_v27 }
  0x6f   : > { %941 = vmatpush1.bf16.msra.mxu1 %v910_v32 }
  0x70   : > { %911 = vmatpush1.bf16.msra.mxu0 %v910_v32  ;;  %933 = vmatprep.subr.bf16.mxu1 %v912_v33 }
  0x71   : > { %913 = vmatprep.subr.bf16.mxu0 %v912_v33 }
  0x73   : > { %942 = vmatpush1.bf16.msra.mxu1 %v914_v38 }
  0x74   : > { %915 = vmatpush1.bf16.msra.mxu0 %v914_v38  ;;  %934 = vmatprep.subr.bf16.mxu1 %v916_v39 }
  0x75   : > { %917 = vmatprep.subr.bf16.mxu0 %v916_v39 }
  0x77   : > { %943 = vmatpush1.bf16.msra.mxu1 %v918_v44 }
  0x78   : > { %919 = vmatpush1.bf16.msra.mxu0 %v918_v44  ;;  %935 = vmatprep.subr.bf16.mxu1 %v920_v47 }
  0x79   : > { %921 = vmatprep.subr.bf16.mxu0 %v920_v47 }
  0x7b   : > { %944 = vmatpush1.bf16.msra.mxu1 %v922_v52 }
  0x7c   : > { %923 = vmatpush1.bf16.msra.mxu0 %v922_v52  ;;  %936 = vmatprep.subr.bf16.mxu1 %v924_v53 }
  0x7d   : > { %925 = vmatprep.subr.bf16.mxu0 %v924_v53 }
  0x7f   : > { %945 = vmatpush1.bf16.msra.mxu1 %v926_v57 }
  0x80   : > { %927 = vmatpush1.bf16.msra.mxu0 %v926_v57 }
  0x82   : > { %608 = vmatmul.mubr.f32.vlgmr.msra.gmra.mrb[4].mxu1 %v528_v60 }
  0x83   : > { %602 = vmatmul.mubr.f32.vlgmr.msra.gmra.mrb[0].mxu0 %v523_v61 }
 0x131   : > { %v391_v62 = vpop.f32.mrb[0].mxu1 }
 0x132   : > { %v393_v0 = vpop.f32.mrb[1].mxu1 }
 0x135   : > { %v397_v63 = vpop.f32.mrb[2].mxu1 }
 0x136   : > { %v478_v1 = vpop.f32.mrb[2].mxu0  ;;  %v399_v2 = vpop.f32.mrb[3].mxu1 }
 0x137   : > { %v479_v46 = vadd.f32 %v478_v1, %v397_v63  ;;  %v480_v3 = vpop.f32.mrb[3].mxu0 }
 0x138   : > { %v481_v4 = vadd.f32 %v480_v3, %v399_v2 }
 0x155   : > { %v609_v45 = vpop.f32.mrb[4].mxu1 }
 0x156   : > { %v603_v5 = vpop.f32.mrb[0].mxu0  ;;  %v616_v6 = vadd.f32 %v609_v45, %v479_v46  ;;  %v611_v7 = vpop.f32.mrb[5].mxu1 }
 0x157   : > { %v946_v8 = vadd.f32 %v603_v5, %v391_v62  ;;  %v605_v9 = vpop.f32.mrb[1].mxu0  ;;  %v617_v10 = vadd.f32 %v611_v7, %v481_v4 }
 0x158   : > { %v947_v11 = vadd.f32 %v605_v9, %v393_v0 }
 0x159   : > { %v619_v12 = vmax.f32 %v617_v10, 0.0  ;;  %v623_v13 = vadd.f32 1e-08, %v617_v10 }
 0x15a   : > { %v618_v14 = vmax.f32 %v947_v11, 0.0  ;;  %v622_v15 = vadd.f32 1e-08, %v947_v11 }
 0x15b   : > { %v621_v16 = vmin.f32 %v619_v12, 1.0  ;;  %1014 = vrcp.f32 %v623_v13 }
 0x15c   : > { %v620_v17 = vmin.f32 %v618_v14, 1.0  ;;  %1016 = vrcp.f32 %v622_v15 }
 0x15d   : > { %652 = vst [vmem:[%s216_s7 + $0x8] sm:$0xff] %v621_v16 }
 0x15e   : > { %651 = vst [vmem:[%s216_s7] sm:$0xff] %v620_v17 }
 0x15f   : > { %1059 = shalt.err (!%p1056_p7)
}
 0x160   : > { %s1060_s27 = scalar_lea.hbm %s1331_s12, 256  ;;  %s1064_s30 = scalar_lea.hbm %s1422_s4, 512 }
 0x161   : > { %p1061_p8 = scmp.ne.s32.totalorder %s1331_s12, %s1060_s27  ;;  %p1065_p1 = scmp.lt.u32.totalorder %s1331_s12, %s1422_s4 }
 0x162   : > { %p1066_p0 = scmp.lt.u32.totalorder %s1064_s30, %s1060_s27  ;;  %p1068_p6 = scmp.lt.u32.totalorder %s1060_s27, %s1331_s12 }
 0x163   : > { %p1062_p11 = pnand %p1061_p8, %p1433_p9 }
 0x164   : > { %p1067_p5 = por %p1066_p0, %p1065_p1 }
 0x165   : > { %p1063_p13 = pneg %p1062_p11 }
 0x166   : > { %p1069_p10 = por %p1068_p6, %p1067_p5 }
 0x168   : > { %p1070_p12 = pnand %p1069_p10, %p1063_p13 }
 0x16a   : > { %1073 = shalt.err (!%p1070_p12)
}
 0x16b   : > { %s1150_s11 = smov 128   ;;  %s1151_s14 = smov 8   ;;  %v1015_v18 = vpop.eup %1014  ;;  %v809_v25 = vld [vmem:[%s1420_s2] ss:$0 sm:$0xff] }
 0x16c   : > { %960 = dma.vmem_to_hbm [thread:$0]  (%p1433_p9), %s1324_s8, 256, %s1331_s12, %s659_s13, %s1150_s11, %s1150_s11, %s1151_s14   ;;  %v1017_v19 = vpop.eup %1016  ;;  %v627_v20 = vmul.f32 36.0, %v1015_v18 }
 0x16d   : > { %v625_v21 = vmul.f32 36.0, %v1017_v19  ;;  %s209_s8 = scalar_lea.vmem [#allocation5], %s800_s6  ;;  %s1372_s27 = scalar_lea.hbm %s1421_s3, %s818_s9 }
 0x16e   : > { %v629_v22 = vmul.f32 %v627_v20, %v621_v16  ;;  %s672_s12 = sshll.u32 %s209_s8, 4  ;;  %s654_s6 = scalar_lea.sflag [#allocation4], %s1318_s5  ;;  %s1365_s12 = int_to_ptr.vmem [resolvable:$true] %s672_s12 }
 0x16f   : > { %v628_v23 = vmul.f32 %v625_v21, %v620_v17  ;;  %s1074_s28 = scalar_lea.vmem %s1365_s12, 256  ;;  %s1152_s29 = smov [#allocation5]  }
 0x170   : > { %v631_v26 = vmul.f32 %v629_v22, %v616_v6  ;;  %p1075_p2 = scmp.ne.s32.totalorder %s1365_s12, %s1074_s28  ;;  %s1078_s30 = sshll.u32 %s1152_s29, 4  ;;  %s1079_s30 = int_to_ptr.vmem [resolvable:$false] %s1078_s30 }
 0x171   : > { %v630_v24 = vmul.f32 %v946_v8, %v628_v23  ;;  %s1080_s7 = scalar_lea.vmem %s1079_s30, 512  ;;  %p1081_p7 = scmp.lt.s32.totalorder %s1365_s12, %s1079_s30 }
 0x172   : > { %v640_v27 = vadd.f32 %v809_v25, %v631_v26  ;;  %p1076_p3 = pnand %p1075_p2, %p1433_p9  ;;  %p1082_p8 = scmp.lt.s32.totalorder %s1080_s7, %s1074_s28 }
 0x173   : > { %v639_v28 = vadd.f32 %v809_v25, %v630_v24 }
 0x174   : > { %v642_v29 = vmul.f32 %v640_v27, %v621_v16  ;;  %p1077_p4 = pneg %p1076_p3  ;;  %p1083_p11 = por %p1082_p8, %p1081_p7 }
 0x175   : > { %v641_v30 = vmul.f32 %v639_v28, %v620_v17 }
 0x176   : > { %vm644_vm3 = vcmp.gt.f32.partialorder %v642_v29, 0.0  ;;  %v646_v31 = vmul.f32 0.01, %v642_v29  ;;  %p1084_p13 = pnand %p1083_p11, %p1077_p4 }
 0x177   : > { %vm643_vm4 = vcmp.gt.f32.partialorder %v641_v30, 0.0  ;;  %v645_v32 = vmul.f32 0.01, %v641_v30 }
 0x178   : > { %v648_v33 = vsel %vm644_vm3, %v642_v29, %v646_v31 }
 0x179   : > { %v647_v34 = vsel %vm643_vm4, %v641_v30, %v645_v32  ;;  %650 = vst [vmem:[%s209_s8 + $0x8] sm:$0xff] %v648_v33 }
 0x17a   : > { %649 = vst [vmem:[%s209_s8] sm:$0xff] %v647_v34 }
 0x17b   : > { %1087 = shalt.err (!%p1084_p13)
}
 0x17c   : > { %s1088_s19 = scalar_lea.hbm %s1372_s27, 256  ;;  %s1092_s20 = scalar_lea.hbm %s1421_s3, 512 }
 0x17d   : > { %p1089_p1 = scmp.ne.s32.totalorder %s1372_s27, %s1088_s19  ;;  %p1093_p6 = scmp.lt.u32.totalorder %s1372_s27, %s1421_s3 }
 0x17e   : > { %p1094_p10 = scmp.lt.u32.totalorder %s1092_s20, %s1088_s19  ;;  %p1096_p2 = scmp.lt.u32.totalorder %s1088_s19, %s1372_s27 }
 0x17f   : > { %p1090_p0 = pnand %p1089_p1, %p1433_p9 }
 0x180   : > { %p1095_p12 = por %p1094_p10, %p1093_p6 }
 0x181   : > { %p1091_p5 = pneg %p1090_p0 }
 0x182   : > { %p1097_p3 = por %p1096_p2, %p1095_p12 }
 0x184   : > { %p1098_p4 = pnand %p1097_p3, %p1091_p5 }
 0x186   : > { %1101 = shalt.err (!%p1098_p4)
}
 0x187   : > { %959 = dma.vmem_to_hbm [thread:$0]  (%p1433_p9), %s1365_s12, 256, %s1372_s27, %s654_s6, %s1150_s11, %s1150_s11, %s1151_s14  }
 0x188 PF: > { %p976_p7 = scmp.ge.s32.totalorder %s1144_s18, 2  ;;  %s703_s13 = sand.u32 1, %s1132_s15  }
 0x189   : > { %p1434_p8 = scmp.ne.s32.totalorder %s1427_s26, 0  ;;  %s704_s23 = scalar_lea.sflag [#allocation4], %s703_s13 }
 0x18b   : > { %p968_p11 = pnand %p976_p7, %p1434_p8 }
 0x18d   : > { %1123 = dma.done.wait (!%p968_p11), %s704_s23, 256  }
 0x18e   : > { %1125 = vsyncadd (!%p968_p11), %s704_s23, 4294967040  ;;  %s713_s25 = scalar_lea.sflag [#allocation7], %s703_s13 }
 0x18f   : > { %1127 = dma.done.wait (!%p968_p11), %s713_s25, 256  }
 0x190   : > { %1129 = vsyncadd (!%p968_p11), %s713_s25, 4294967040  ;;  %p19_p9 = scmp.ge.s32.totalorder %s1203_s21, 4   ;;  %s1435_s15 = smov %s1136_s16 }
 0x191   : > { %s1436_s16 = smov %s1140_s17  ;;  %s1437_s17 = smov %s1214_s24 }
 0x192   : > { %s1438_s18 = smov %s1203_s21  ;;  %21 = sbr.rel (!%p19_p9) target bundleno = 6 (0x6), region = 91 }
 0x199   :  { %718 = vsyncpa [#allocation3], 1 }
 0x19a   :  { %720 = vsyncpa [#allocation3 + $0x1], 1 }
 0x19b   :  { %721 = vsyncpa [#allocation4], 1 }
 0x19c   :  { %723 = vsyncpa [#allocation4 + $0x1], 1 }
 0x19d   :  { %724 = vsyncpa [#allocation7], 1 }
 0x19e   :  { %726 = vsyncpa [#allocation7 + $0x1], 1 }

</bundles_post_ra>
